<compile_context>
chip_gen: v6e
topology: v6e:2x2x1
jax: 0.10.0
libtpu: 0.0.40
codegen_flags: <defaults>
</compile_context>

<pallas_src>
import functools

import jax
import jax.numpy as jnp
from jax.experimental import pallas as pl
from jax.experimental.pallas import tpu as pltpu


# ---------------------------------------------------------------------------
# Kernels
# ---------------------------------------------------------------------------
def _mxu_kernel(x_ref, m_ref, b_ref, o_ref):
    # x_ref: (C, T)      one batch element, channels x spatial tile
    # m_ref: (C_out, C)  banded channel-mixing matrix (resident in VMEM)
    # b_ref: (C_out, 1)  per-output-channel bias (resident in VMEM)
    # o_ref: (C_out, T)
    mixed = jnp.dot(m_ref[...], x_ref[...].astype(jnp.float32),
                    preferred_element_type=jnp.float32)
    o_ref[...] = (mixed + b_ref[...]).astype(o_ref.dtype)


def _vpu_kernel(x_ref, w_ref, b_ref, o_ref, *, c_out, nnb):
    # Small-C path: band mix as nnb shifted multiply-adds on the VPU.
    # Start the accumulator from the broadcast bias so the add is fused in.
    acc = jnp.broadcast_to(b_ref[...].astype(jnp.float32), o_ref.shape)
    for j in range(nnb):                                        # nnb is small; unrolled
        wj = w_ref[:, j:j + 1].astype(jnp.float32)              # (C_out, 1)
        acc = acc + wj * x_ref[j:j + c_out, :].astype(jnp.float32)
    o_ref[...] = acc.astype(o_ref.dtype)


# ---------------------------------------------------------------------------
# Glue
# ---------------------------------------------------------------------------
def _build_band_matrix(weights, c_in):
    """Vectorized construction of the (C_out, C) banded mixing matrix."""
    c_out, nnb = weights.shape
    row = jnp.arange(c_out)[:, None]                            # (C_out, 1)
    col = jnp.arange(c_in)[None, :]                             # (1, C)
    off = col - row                                             # (C_out, C)
    mask = (off >= 0) & (off < nnb)
    gathered = jnp.take_along_axis(weights, jnp.clip(off, 0, nnb - 1), axis=1)
    return jnp.where(mask, gathered, 0.0).astype(jnp.float32)


def _choose_tile_hw(c_in, c_out, hw_aligned, elt_bytes):
    """Largest 128-multiple lane tile that keeps double-buffered x/out tiles
    plus the resident mixing matrix under a ~24 MiB VMEM budget (v7x-safe)."""
    budget = 24 * 1024 * 1024

    def fits(t):
        io = 2 * (c_in * elt_bytes + c_out * elt_bytes) * t      # 2x-buffered x + out
        resident = c_in * c_out * 4 + c_out * 4                  # weights + bias (f32)
        return io + resident <= budget

    if hw_aligned <= 2048 and fits(hw_aligned):
        return hw_aligned
    for cand in (2048, 1024, 512, 256, 128):
        if cand <= hw_aligned and fits(cand):
            return cand
    return 128


def neigh_conv(x, weights, biases, neigh_number):
    """x: (B, C, H, W).  weights: (C-nnb+1, nnb).  biases: (C-nnb+1,)."""
    B, C, H, W = x.shape
    nnb = int(neigh_number)
    assert 1 <= nnb <= C, "neigh_number must satisfy 1 <= neigh_number <= channels"
    c_out = C - nnb + 1
    assert weights.shape == (c_out, nnb)
    assert biases.shape == (c_out,)

    out_dtype = x.dtype
    elt_bytes = jnp.dtype(out_dtype).itemsize

    hw = H * W
    lane = 128
    hw_aligned = -(-hw // lane) * lane
    tile_hw = _choose_tile_hw(C, c_out, hw_aligned, elt_bytes)
    hw_pad = -(-hw // tile_hw) * tile_hw

    x_flat = x.reshape(B, C, hw)
    if hw_pad != hw:
        # Keep output stores lane-dense: pad flattened spatial axis to the tile.
        x_flat = jnp.pad(x_flat, ((0, 0), (0, 0), (0, hw_pad - hw)))

    bias_col = biases.reshape(c_out, 1).astype(jnp.float32)

    use_mxu = C >= 8
    if use_mxu:
        mix = _build_band_matrix(weights.astype(jnp.float32), C)   # (C_out, C)
        kernel = _mxu_kernel
        mix_spec = pl.BlockSpec((c_out, C), lambda b, t: (0, 0))
        flops = 2 * B * c_out * C * hw_pad
    else:
        mix = weights.astype(jnp.float32)                          # (C_out, nnb)
        kernel = functools.partial(_vpu_kernel, c_out=c_out, nnb=nnb)
        mix_spec = pl.BlockSpec((c_out, nnb), lambda b, t: (0, 0))
        flops = 2 * B * c_out * nnb * hw_pad

    bytes_accessed = (elt_bytes * B * (C + c_out) * hw_pad
                      + 4 * (int(mix.size) + c_out))

    out_flat = pl.pallas_call(
        kernel,
        out_shape=jax.ShapeDtypeStruct((B, c_out, hw_pad), out_dtype),
        grid=(B, hw_pad // tile_hw),
        in_specs=[
            pl.BlockSpec((None, C, tile_hw), lambda b, t: (b, 0, t)),  # x tile
            mix_spec,                                                  # weights (resident)
            pl.BlockSpec((c_out, 1), lambda b, t: (0, 0)),             # bias (resident)
        ],
        out_specs=pl.BlockSpec((None, c_out, tile_hw), lambda b, t: (b, 0, t)),
        compiler_params=pltpu.CompilerParams(
            dimension_semantics=("parallel", "parallel")),
        cost_estimate=pl.CostEstimate(
            flops=flops, bytes_accessed=bytes_accessed, transcendentals=0),
    )(x_flat, mix, bias_col)

    return out_flat[:, :, :hw].reshape(B, c_out, H, W)


def ref_forward(x, weights, biases, nnb):
    """Pure-JAX reference replicating the PyTorch loop semantics exactly."""
    B, C, H, W = x.shape
    outs = []
    for i in range(C - nnb + 1):
        win = x[:, i:i + nnb]                                    # (B, nnb, H, W)
        conv = jnp.einsum("bnhw,n->bhw", win, weights[i]) + biases[i]
        outs.append(conv)
    return jnp.stack(outs, axis=1)


# ---------------------------------------------------------------------------
# Demo / self-check
# ---------------------------------------------------------------------------
if __name__ == "__main__":
    def make_inputs(key, B, C, H, W, nnb):
        kx, kw, kb = jax.random.split(key, 3)
        x = jax.random.normal(kx, (B, C, H, W), dtype=jnp.float32)
        # Conv2d-style init: uniform(-1/sqrt(fan_in), 1/sqrt(fan_in)), fan_in = nnb*1*1.
        bound = 1.0 / (nnb ** 0.5)
        weights = jax.random.uniform(kw, (C - nnb + 1, nnb),
                                     minval=-bound, maxval=bound, dtype=jnp.float32)
        biases = jax.random.uniform(kb, (C - nnb + 1,),
                                    minval=-bound, maxval=bound, dtype=jnp.float32)
        return x, weights, biases

    NEIGH = 3

    # Primary test at the module's small shapes (C=4 -> VPU band-mix path).
    B, C, H, W = 2, 4, 16, 16
    x, weights, biases = make_inputs(jax.random.PRNGKey(0), B, C, H, W, NEIGH)
    out = jax.block_until_ready(neigh_conv(x, weights, biases, NEIGH))
    ref = ref_forward(x, weights, biases, NEIGH)
    assert out.shape == (B, C - NEIGH + 1, H, W)
    assert jnp.allclose(out, ref, atol=1e-4, rtol=1e-4), "mismatch vs reference (VPU path)"

    # Secondary test: larger C (MXU path) + non-128-multiple spatial (padding path).
    B2, C2, H2, W2 = 2, 16, 8, 8
    x2, w2, b2 = make_inputs(jax.random.PRNGKey(1), B2, C2, H2, W2, NEIGH)
    out2 = jax.block_until_ready(neigh_conv(x2, w2, b2, NEIGH))
    ref2 = ref_forward(x2, w2, b2, NEIGH)
    assert out2.shape == (B2, C2 - NEIGH + 1, H2, W2)
    assert jnp.allclose(out2, ref2, atol=1e-4, rtol=1e-4), "mismatch vs reference (MXU path)"

    print("KERNEL_OK")
</pallas_src>

<mosaic_0001>
module attributes {stable_mosaic.version = 11 : i64} {
  func.func @_vpu_kernel(%arg0: i32, %arg1: i32, %arg2: memref<1x4x256xf32, #tpu.memory_space<vmem>>, %arg3: memref<2x3xf32, #tpu.memory_space<vmem>>, %arg4: memref<2x1xf32, #tpu.memory_space<vmem>>, %arg5: memref<1x2x256xf32, #tpu.memory_space<vmem>>) attributes {dimension_semantics = [#tpu.dimension_semantics<parallel>, #tpu.dimension_semantics<parallel>], iteration_bounds = array<i64: 2, 1>, scalar_prefetch = 0 : i64, scratch_operands = 0 : i64, tpu.core_type = #tpu.core_type<tc>, window_params = [{transform_indices = @transform_0, window_bounds = array<i64: 1, 4, 256>}, {pipeline_mode = #tpu.pipeline_mode<synchronous>, transform_indices = @transform_1, window_bounds = array<i64: 2, 3>}, {pipeline_mode = #tpu.pipeline_mode<synchronous>, transform_indices = @transform_2, window_bounds = array<i64: 2, 1>}, {transform_indices = @transform_3, window_bounds = array<i64: 1, 2, 256>}]} {
    %c0 = arith.constant 0 : index
    %c0_0 = arith.constant 0 : index
    %0 = vector.load %arg4[%c0, %c0_0] : memref<2x1xf32, #tpu.memory_space<vmem>>, vector<2x1xf32>
    %1 = vector.shape_cast %0 : vector<2x1xf32> to vector<2x1xf32>
    %2 = vector.broadcast %1 : vector<2x1xf32> to vector<2x256xf32>
    %c0_1 = arith.constant 0 : index
    %c0_2 = arith.constant 0 : index
    %3 = vector.load %arg3[%c0_1, %c0_2] : memref<2x3xf32, #tpu.memory_space<vmem>>, vector<2x1xf32>
    %c0_3 = arith.constant 0 : index
    %c0_4 = arith.constant 0 : index
    %c0_5 = arith.constant 0 : index
    %4 = vector.load %arg2[%c0_3, %c0_4, %c0_5] : memref<1x4x256xf32, #tpu.memory_space<vmem>>, vector<1x2x256xf32>
    %5 = vector.shape_cast %4 : vector<1x2x256xf32> to vector<2x256xf32>
    %6 = vector.broadcast %3 : vector<2x1xf32> to vector<2x256xf32>
    %7 = arith.mulf %6, %5 : vector<2x256xf32>
    %8 = arith.addf %2, %7 : vector<2x256xf32>
    %c0_6 = arith.constant 0 : index
    %c1 = arith.constant 1 : index
    %9 = vector.load %arg3[%c0_6, %c1] : memref<2x3xf32, #tpu.memory_space<vmem>>, vector<2x1xf32>
    %c0_7 = arith.constant 0 : index
    %c1_8 = arith.constant 1 : index
    %c0_9 = arith.constant 0 : index
    %10 = vector.load %arg2[%c0_7, %c1_8, %c0_9] : memref<1x4x256xf32, #tpu.memory_space<vmem>>, vector<1x2x256xf32>
    %11 = vector.shape_cast %10 : vector<1x2x256xf32> to vector<2x256xf32>
    %12 = vector.broadcast %9 : vector<2x1xf32> to vector<2x256xf32>
    %13 = arith.mulf %12, %11 : vector<2x256xf32>
    %14 = arith.addf %8, %13 : vector<2x256xf32>
    %c0_10 = arith.constant 0 : index
    %c2 = arith.constant 2 : index
    %15 = vector.load %arg3[%c0_10, %c2] : memref<2x3xf32, #tpu.memory_space<vmem>>, vector<2x1xf32>
    %c0_11 = arith.constant 0 : index
    %c2_12 = arith.constant 2 : index
    %c0_13 = arith.constant 0 : index
    %16 = vector.load %arg2[%c0_11, %c2_12, %c0_13] : memref<1x4x256xf32, #tpu.memory_space<vmem>>, vector<1x2x256xf32>
    %17 = vector.shape_cast %16 : vector<1x2x256xf32> to vector<2x256xf32>
    %18 = vector.broadcast %15 : vector<2x1xf32> to vector<2x256xf32>
    %19 = arith.mulf %18, %17 : vector<2x256xf32>
    %20 = arith.addf %14, %19 : vector<2x256xf32>
    %c0_14 = arith.constant 0 : index
    %c0_15 = arith.constant 0 : index
    %c0_16 = arith.constant 0 : index
    %21 = vector.load %arg5[%c0_14, %c0_15, %c0_16] : memref<1x2x256xf32, #tpu.memory_space<vmem>>, vector<1x2x256xf32>
    %22 = vector.shape_cast %21 : vector<1x2x256xf32> to vector<2x256xf32>
    %23 = vector.shape_cast %20 : vector<2x256xf32> to vector<1x2x256xf32>
    tpu.vector_store %arg5[%c0_14, %c0_15, %c0_16], %23 {strides = array<i32>} : memref<1x2x256xf32, #tpu.memory_space<vmem>>, vector<1x2x256xf32>,
    return
  }
  func.func @transform_0(%arg0: i32, %arg1: i32) -> (i32, i32, i32) {
    %c0_i32 = arith.constant 0 : i32
    %c0_i32_0 = arith.constant 0 : i32
    return %arg0, %c0_i32, %arg1 : i32, i32, i32
  }
  func.func @transform_1(%arg0: i32, %arg1: i32) -> (i32, i32) {
    %c0_i32 = arith.constant 0 : i32
    %c0_i32_0 = arith.constant 0 : i32
    %c0_i32_1 = arith.constant 0 : i32
    return %c0_i32, %c0_i32_0 : i32, i32
  }
  func.func @transform_2(%arg0: i32, %arg1: i32) -> (i32, i32) {
    %c0_i32 = arith.constant 0 : i32
    %c0_i32_0 = arith.constant 0 : i32
    %c0_i32_1 = arith.constant 0 : i32
    return %c0_i32, %c0_i32_0 : i32, i32
  }
  func.func @transform_3(%arg0: i32, %arg1: i32) -> (i32, i32, i32) {
    %c0_i32 = arith.constant 0 : i32
    %c0_i32_0 = arith.constant 0 : i32
    return %arg0, %c0_i32, %arg1 : i32, i32, i32
  }
}

</mosaic_0001>

<bundles_post_ra>
// kernel: tpu_custom_call.1
= control target key start
LH: loop header
LB: loop body
LE: loop exit
PB: predicated region body
PF: predicated region fallthrough
CT: control target
= control target key end

     0   :  { %8 = vsyncpa [#allocation3], 0  ;;  %s746_s0 = inlined_call_operand.hbm [shape: f32[2,4,256], index: 0, kind: input, shape index: {}]   ;;  %s747_s1 = inlined_call_operand.vmem [shape: f32[2,3], index: 1, kind: input, shape index: {}]   ;;  %s748_s2 = inlined_call_operand.vmem [shape: f32[2,1], index: 2, kind: input, shape index: {}]   ;;  %s749_s3 = inlined_call_operand.hbm [shape: f32[2,2,256], index: 3, kind: output, shape index: {}]  }
   0x1   :  { %10 = vsyncpa [#allocation3 + $0x1], 0 }
   0x2   :  { %11 = vsyncpa [#allocation4], 0 }
   0x3   :  { %13 = vsyncpa [#allocation4 + $0x1], 0  ;;  %s599_s12 = smov 0   ;;  %s601_s13 = smov 0  }
   0x4   :  { %s603_s14 = smov 0   ;;  %s605_s15 = smov 0  }
   0x5   :  { %s607_s16 = smov 0   ;;  %s609_s17 = smov 0  }
   0x6 LB: > { %s374_s18 = sadd.s32 4294967295, %s572_s17   ;;  %s375_s19 = sadd.s32 4294967294, %s572_s17   ;;  %s572_s17 = sphi %s609_s17, %s19_s17   ;;  %s568_s16 = sphi %s607_s16, %s761_s16   ;;  %s564_s15 = sphi %s605_s15, %s760_s15   ;;  %s560_s14 = sphi %s603_s14, %s759_s14   ;;  %s556_s13 = sphi %s601_s13, %s758_s13   ;;  %s552_s12 = sphi %s599_s12, %s757_s12  }
   0x7   : > { %s31_s20 = sadd.s32 1, %s568_s16  ;;  %s40_s21 = sadd.s32 1, %s560_s14 }
   0x8   : > { %p33_p0 = scmp.ge.s32.totalorder %s31_s20, 2  ;;  %p47_p1 = scmp.ne.s32.totalorder %s560_s14, %s556_s13 }
   0x9   : > { %p48_p2 = scmp.eq.s32.totalorder %s572_s17, 0  ;;  %p53_p3 = scmp.ne.s32.totalorder %s556_s13, %s552_s12 }
   0xa   : > { %s763_s20 = smov (%p33_p0, %s31_s20), 0  ;;  %p54_p5 = scmp.eq.s32.totalorder %s374_s18, 0 }
   0xb   : > { %p640_p4 = por %p48_p2, %p47_p1  ;;  %s35_s23 = ssub.s32 %s568_s16, %s763_s20 }
   0xc   : > { %p121_p6 = scmp.eq.s32.totalorder %s374_s18, 1  ;;  %p38_p7 = scmp.eq.s32.totalorder %s35_s23, 0 }
   0xd   : > { %p646_p8 = por %p54_p5, %p53_p3  ;;  %p127_p10 = scmp.eq.s32.totalorder %s375_s19, 1 }
   0xe   : > { %p650_p9 = por %p121_p6, %p47_p1  ;;  %p404_p13 = scmp.lt.s32.totalorder %s572_s17, 2 }
   0xf   : > { %s655_s26 = scalar_select %p38_p7, %s560_s14, %s40_s21  }
  0x10   : > { %p657_p11 = por %p127_p10, %p53_p3  ;;  %s153_s28 = sand.u32 1, %s560_s14  }
  0x11   : > { %s378_s29 = sshll.u32 %s153_s28, 3  ;;  %s390_s30 = sshll.u32 %s568_s16, 7 }
  0x12   : > { %s753_s27 = scalar_select %p657_p11, 1, 0 }
  0x13   : > { %s165_s6 = scalar_lea.hbm %s746_s0, %s390_s30  ;;  %s157_s7 = scalar_lea.vmem [#allocation2], %s378_s29 }
  0x14   : > { %s167_s8 = sshll.u32 %s157_s7, 4  ;;  %p670_p0 = pnand %p404_p13, %p640_p4  ;;  %s168_s8 = int_to_ptr.vmem [resolvable:$true] %s167_s8 }
  0x15   : > { %p381_p1 = scmp.ge.s32.totalorder %s572_s17, 1  ;;  %p172_p2 = scmp.lt.s32.totalorder %s572_s17, 3 }
  0x16   : > { %s154_s10 = scalar_lea.sflag [#allocation3], %s153_s28  ;;  %p466_p3 = pneg %p670_p0 }
  0x17   : > { %s477_s11 = scalar_lea.vmem %s168_s8, 128  ;;  %s574_s18 = smov [#allocation2]  }
  0x18   : > { %p478_p5 = scmp.ne.s32.totalorder %s168_s8, %s477_s11  ;;  %s482_s19 = sshll.u32 %s574_s18, 4  ;;  %s483_s19 = int_to_ptr.vmem [resolvable:$false] %s482_s19 }
  0x19   : > { %s484_s21 = scalar_lea.vmem %s483_s19, 256  ;;  %p485_p10 = scmp.lt.s32.totalorder %s168_s8, %s483_s19 }
  0x1a   : > { %p480_p6 = pnand %p478_p5, %p466_p3  ;;  %p486_p12 = scmp.lt.s32.totalorder %s484_s21, %s477_s11 }
  0x1c   : > { %p481_p7 = pneg %p480_p6  ;;  %p487_p4 = por %p486_p12, %p485_p10 }
  0x1e   : > { %p488_p13 = pnand %p487_p4, %p481_p7 }
  0x20   : > { %491 = shalt.err (!%p488_p13)
}
  0x21   : > { %399 = dma.hbm_to_vmem [thread:$0]  (!%p670_p0), %s165_s6, 128, %s168_s8, %s154_s10  }
  0x22   : > { %p173_p11 = pnand %p381_p1, %p172_p2 }
  0x23   : > { %s685_s22 = sand.u32 (!%p173_p11), 1, %s556_s13  }
  0x24   : > { %176 = sbr.rel (%p173_p11) target bundleno = 193 (0xc1), region = 32  ;;  %s382_s23 = sshll.u32 (!%p173_p11), %s685_s22, 3 }
  0x25   : > { %s179_s28 = scalar_lea.sflag (!%p173_p11), [#allocation3], %s685_s22  ;;  %s182_s29 = scalar_lea.vmem (!%p173_p11), [#allocation2], %s382_s23 }
  0x29   : > { %543 = dma.done.wait (%p646_p8), %s179_s28, 128  }
  0x2a   : > { %545 = vsyncadd (%p646_p8), %s179_s28, 4294967168  ;;  %v575_v0 = vmov 0   ;;  %v576_v1 = vmov 1   ;;  %v213_v2 = vld [vmem:[%s747_s1] sm:$0x3]  ;;  %v577_v6 = vmov 2  }
  0x2b   : > { %457 = vset.pattern.permute.xlu0 %v575_v0  ;;  %458 = vset.pattern.permute.xlu1 %v576_v1  ;;  %v227_v3 = vld [vmem:[%s747_s1] sm:$0x3]  ;;  %v245_v8 = vld [vmem:[%s182_s29] sm:$0xcc]  ;;  %s383_s10 = sshll.u32 %s685_s22, 2  ;;  %s391_s11 = sshll.u32 %s564_s15, 6 }
  0x2c   : > { %217 = vperm.xlu0 %457, %v213_v2   ;;  %231 = vperm.xlu1 %458, %v227_v3   ;;  %v207_v4 = vld [vmem:[%s748_s2] sm:$0x3]  ;;  %v252_v11 = vcombine.high %v245_v8, %v245_v8  ;;  %v253_v17 = vrot.slane %v245_v8, 2  ;;  %s204_s18 = scalar_lea.vmem [#allocation5], %s383_s10  ;;  %s288_s28 = scalar_lea.hbm %s749_s3, %s391_s11 }
  0x2d   : > { %v244_v5 = vld [vmem:[%s747_s1] sm:$0x3]  ;;  %s290_s19 = sshll.u32 %s204_s18, 4  ;;  %s578_s4 = smov [#allocation5]   ;;  %s291_s19 = int_to_ptr.vmem [resolvable:$true] %s290_s19 }
  0x2e   : > { %v228_v7 = vld [vmem:[%s182_s29] sm:$0x66]  ;;  %v254_v18 = vrot.slane %v252_v11, 2  ;;  %s492_s30 = scalar_lea.vmem %s291_s19, 64  ;;  %s496_s5 = sshll.u32 %s578_s4, 4  ;;  %s497_s5 = int_to_ptr.vmem [resolvable:$false] %s496_s5 }
  0x2f   : > { %v214_v9 = vld [vmem:[%s182_s29] sm:$0x33]  ;;  %v235_v10 = vcombine.high %v228_v7, %v228_v7  ;;  %v236_v15 = vrot.slane %v228_v7, 1  ;;  %s274_s29 = scalar_lea.sflag [#allocation4], %s685_s22  ;;  %p493_p8 = scmp.ne.s32.totalorder %s291_s19, %s492_s30 }
  0x30   : > { %210 = vperm.xlu0 %457, %v207_v4   ;;  %459 = vset.pattern.permute.xlu1 %v577_v6  ;;  %v221_v12 = vcombine.high %v214_v9, %v214_v9  ;;  %s498_s15 = scalar_lea.vmem %s497_s5, 128  ;;  %p499_p0 = scmp.lt.s32.totalorder %s291_s19, %s497_s5 }
  0x31   : > { %248 = vperm.xlu1 %459, %v244_v5   ;;  %v237_v16 = vrot.slane %v235_v10, 1  ;;  %p494_p11 = pnand %p493_p8, %p650_p9  ;;  %p500_p1 = scmp.lt.s32.totalorder %s498_s15, %s492_s30 }
  0x33   : > { %p495_p12 = pneg %p494_p11  ;;  %p501_p2 = por %p500_p1, %p499_p0 }
  0x34   : > { %460 = vset.pattern.permute.xlu0 %v577_v6 }
  0x35   : > { %p502_p3 = pnand %p501_p2, %p495_p12 }
  0xa7   : > { %v218_v13 = vpop.permute.xlu0 %217  ;;  %v232_v14 = vpop.permute.xlu1 %231 }
  0xa8   : > { %v223_v19 = vmul.f32 %v218_v13, %v214_v9  ;;  %v224_v20 = vmul.f32 %v221_v12, %v218_v13  ;;  %v240_v22 = vmul.f32 %v236_v15, %v232_v14  ;;  %v241_v23 = vmul.f32 %v237_v16, %v232_v14 }
  0xab   : > { %v211_v21 = vpop.permute.xlu0 %210 }
  0xac   : > { %v225_v24 = vadd.f32 %v223_v19, %v211_v21  ;;  %v226_v25 = vadd.f32 %v224_v20, %v211_v21  ;;  %v249_v26 = vpop.permute.xlu1 %248 }
  0xad   : > { %v257_v27 = vmul.f32 %v253_v17, %v249_v26  ;;  %v258_v28 = vmul.f32 %v254_v18, %v249_v26 }
  0xae   : > { %v242_v29 = vadd.f32 %v240_v22, %v225_v24  ;;  %v243_v30 = vadd.f32 %v241_v23, %v226_v25 }
  0xb0   : > { %v259_v31 = vadd.f32 %v257_v27, %v242_v29  ;;  %v260_v32 = vadd.f32 %v258_v28, %v243_v30 }
  0xb2   : > { %v263_v33 = vcombine.low %v259_v31, %v260_v32 }
  0xb4   : > { %384 = vst.sshfl [vmem:[%s204_s18] sm:$0x33 pattern:$0x76325410] %v263_v33 }
  0xb5   : > { %505 = shalt.err (!%p502_p3)
}
  0xb6   : > { %s506_s6 = scalar_lea.hbm %s288_s28, 64  ;;  %s510_s8 = scalar_lea.hbm %s749_s3, 128 }
  0xb7   : > { %p507_p5 = scmp.ne.s32.totalorder %s288_s28, %s506_s6  ;;  %p511_p10 = scmp.lt.s32.totalorder %s288_s28, %s749_s3 }
  0xb8   : > { %p512_p4 = scmp.lt.s32.totalorder %s510_s8, %s506_s6 }
  0xb9   : > { %p508_p6 = pnand %p507_p5, %p650_p9 }
  0xba   : > { %p513_p13 = por %p512_p4, %p511_p10 }
  0xbb   : > { %p509_p7 = pneg %p508_p6 }
  0xbd   : > { %p514_p8 = pnand %p513_p13, %p509_p7 }
  0xbf   : > { %517 = shalt.err (!%p514_p8)
}
  0xc0   : > { %394 = dma.vmem_to_hbm [thread:$0]  (%p650_p9), %s291_s19, 64, %s288_s28, %s274_s29  }
  0xc1 PF: > { %s302_s10 = sand.u32 1, %s552_s12   ;;  %p755_p11 = scmp.ne.s32.totalorder %s753_s27, 0 }
  0xc2   : > { %p756_p12 = scmp.ge.s32.totalorder %s572_s17, 2  ;;  %s303_s11 = scalar_lea.sflag [#allocation4], %s302_s10 }
  0xc4   : > { %p401_p0 = pnand %p756_p12, %p755_p11 }
  0xc6   : > { %p402_p1 = pneg %p401_p0 }
  0xc8   : > { %547 = dma.done.wait (%p402_p1), %s303_s11, 64  }
  0xc9   : > { %549 = vsyncadd (%p402_p1), %s303_s11, 4294967232  ;;  %s19_s17 = sadd.s32 1, %s572_s17   ;;  %s757_s12 = smov %s556_s13 }
  0xca   : > { %p16_p2 = scmp.ge.s32.totalorder %s19_s17, 4   ;;  %s758_s13 = smov %s560_s14 }
  0xcb   : > { %s759_s14 = smov %s655_s26  ;;  %s760_s15 = smov %s568_s16 }
  0xcc   : > { %s761_s16 = smov %s763_s20  ;;  %18 = sbr.rel (!%p16_p2) target bundleno = 6 (0x6), region = 77 }
  0xd1   :  { %308 = vsyncpa [#allocation3], 1 }
  0xd2   :  { %310 = vsyncpa [#allocation3 + $0x1], 1 }
  0xd3   :  { %311 = vsyncpa [#allocation4], 1 }
  0xd4   :  { %313 = vsyncpa [#allocation4 + $0x1], 1 }

</bundles_post_ra>
